<compile_context>
chip_gen: v7x
topology: tpu7x:2x2x1
jax: 0.10.0
libtpu: 0.0.40
codegen_flags: <defaults>
</compile_context>

<pallas_src>
import jax
import jax.numpy as jnp
from jax.experimental import pallas as pl
from jax.experimental.pallas import tpu as pltpu


def _cdiv(a, b):
    return -(-a // b)


def _round_up(x, m):
    return _cdiv(x, m) * m


def _tpu_defaults():
    """(n_splits, tile-sizing VMEM budget, vmem_limit_bytes) per generation."""
    kind = ""
    try:
        kind = jax.devices()[0].device_kind.lower()
    except Exception:
        pass
    if "v7" in kind:
        # v7x: 2 TensorCores/chip but only 64 MiB VMEM per core.
        return 2, 32 << 20, 48 << 20
    if ("v4" in kind) or ("v5p" in kind):
        # Megacore chips: 2 TCs, 128 MiB physical VMEM.
        return 2, 56 << 20, 100 << 20
    # v5e / v6e: single TC, 128 MiB physical VMEM, tiny default scoped limit.
    return 1, 56 << 20, 100 << 20


def _block_bytes_per_lane(outer, rows, dtype, n_buffers=2):
    """VMEM bytes per spatial lane of one double-buffered (outer, rows, tile) block."""
    itemsize = jnp.dtype(dtype).itemsize
    sublane = max(8, 32 // itemsize)          # f32 -> 8, bf16 -> 16, int8 -> 32
    return n_buffers * outer * _round_up(rows, sublane) * itemsize


def _pick_tile(HW, n_splits, bytes_per_lane, budget_bytes, max_tile):
    tile = budget_bytes // max(bytes_per_lane, 1)
    tile = min(tile, max_tile, _round_up(_cdiv(HW, n_splits), 128))
    return max(128, (tile // 128) * 128)


# ---------------------------------------------------------------------------
# Dense-target path (matches the PyTorch module's contract: arbitrary y_true)
# ---------------------------------------------------------------------------
def _make_dense_kernel(HW, tile, n_tiles, two_d):
    def kernel(yp_ref, yt_ref, tp_out_ref, yts_out_ref, tp_acc, yts_acc):
        if two_d:
            s, t = pl.program_id(0), pl.program_id(1)
            n_t = pl.num_programs(1)
        else:
            s, t = 0, pl.program_id(0)
            n_t = pl.num_programs(0)

        @pl.when(t == 0)
        def _():
            tp_acc[...] = jnp.zeros_like(tp_acc)
            yts_acc[...] = jnp.zeros_like(yts_acc)

        B = yp_ref.shape[0]
        # Mask the ragged spatial tail in-kernel (no host-side jnp.pad copy).
        base = (s * n_tiles + t) * tile
        lane = jax.lax.broadcasted_iota(jnp.int32, (1, 1, tile), 2)
        valid = (base + lane) < HW                                 # (1, 1, T)

        logits = jnp.where(valid, yp_ref[...].astype(jnp.float32), 0.0)
        y_true = jnp.where(valid, yt_ref[...].astype(jnp.float32), 0.0)

        # Channel softmax reduced on the fly: only tp and sum(y) are needed.
        m = jnp.max(logits, axis=1, keepdims=True)                 # (B, 1, T)
        e = jnp.exp(logits - m)                                    # (B, C, T)
        denom = jnp.sum(e, axis=1)                                 # (B, T)
        num = jnp.sum(e * y_true, axis=1)                          # (B, T)

        tp_acc[...] += num * pl.reciprocal(denom, approx=True)
        yts_acc[...] += jnp.sum(y_true, axis=1)

        @pl.when(t == n_t - 1)
        def _():
            # Fold lanes in-kernel; only a tiny (1, B, 128) block hits HBM.
            tp_out_ref[...] = jnp.broadcast_to(
                jnp.sum(tp_acc[...], axis=-1, keepdims=True), (B, 128))[None]
            yts_out_ref[...] = jnp.broadcast_to(
                jnp.sum(yts_acc[...], axis=-1, keepdims=True), (B, 128))[None]

    return kernel


def tversky_loss(y_pred, y_true, beta, *, n_splits=None, vmem_budget_bytes=None,
                 vmem_limit_bytes=None, max_tile=131072):
    """Tversky loss (addone=True) on channel-softmax'd NCHW logits.

    y_pred: (B, C, *spatial) logits; y_true: same-shape (possibly soft)
    targets.  bf16 inputs are recommended (the kernel upcasts to f32).
    """
    assert y_pred.shape == y_true.shape
    B, C = int(y_pred.shape[0]), int(y_pred.shape[1])
    HW = 1
    for d in y_pred.shape[2:]:
        HW *= int(d)
    yp = y_pred.reshape(B, C, HW)
    yt = y_true.reshape(B, C, HW)

    dflt_splits, dflt_budget, dflt_limit = _tpu_defaults()
    n_splits = dflt_splits if n_splits is None else n_splits
    budget = dflt_budget if vmem_budget_bytes is None else vmem_budget_bytes
    vmem_limit = dflt_limit if vmem_limit_bytes is None else vmem_limit_bytes

    bytes_per_lane = (_block_bytes_per_lane(B, C, yp.dtype)
                      + _block_bytes_per_lane(B, C, yt.dtype)
                      + 2 * _round_up(B, 8) * 4)       # f32 scratch accumulators
    tile = _pick_tile(HW, n_splits, bytes_per_lane, budget, max_tile)

    n_blocks = _cdiv(HW, tile)
    n_splits = max(1, min(n_splits, n_blocks))
    n_tiles = _cdiv(n_blocks, n_splits)
    last_block = n_blocks - 1
    two_d = n_splits > 1

    if two_d:
        grid = (n_splits, n_tiles)
        in_map = lambda s, t: (0, 0, jnp.minimum(s * n_tiles + t, last_block))
        out_map = lambda s, t: (s, 0, 0)
        semantics = ("parallel", "arbitrary")
    else:
        grid = (n_tiles,)
        in_map = lambda t: (0, 0, jnp.minimum(t, last_block))
        out_map = lambda t: (0, 0, 0)
        semantics = ("arbitrary",)

    kernel = _make_dense_kernel(HW, tile, n_tiles, two_d)
    tp_parts, yts_parts = pl.pallas_call(
        kernel,
        out_shape=(jax.ShapeDtypeStruct((n_splits, B, 128), jnp.float32),
                   jax.ShapeDtypeStruct((n_splits, B, 128), jnp.float32)),
        grid=grid,
        in_specs=[pl.BlockSpec((B, C, tile), in_map),
                  pl.BlockSpec((B, C, tile), in_map)],
        out_specs=[pl.BlockSpec((1, B, 128), out_map),
                   pl.BlockSpec((1, B, 128), out_map)],
        scratch_shapes=[pltpu.VMEM((B, tile), jnp.float32),
                        pltpu.VMEM((B, tile), jnp.float32)],
        compiler_params=pltpu.CompilerParams(
            dimension_semantics=semantics, vmem_limit_bytes=vmem_limit),
    )(yp, yt)

    # O(B) epilogue: combine splits, tversky index (addone=True), batch mean.
    tp = jnp.sum(tp_parts[:, :, 0], axis=0)            # sum(p * y)
    yt_sum = jnp.sum(yts_parts[:, :, 0], axis=0)
    fn = yt_sum - tp                                    # sum((1-p) * y)
    fp = jnp.float32(HW) - tp                           # sum(p * (1-y)); sum_C p == 1
    ti = (tp + 1.0) / (1.0 + tp + beta * fn + (1.0 - beta) * fp)
    return jnp.mean(1.0 - ti)


# ---------------------------------------------------------------------------
# Integer-label fast path (hard one-hot targets): halves+ HBM traffic by not
# streaming the dense one-hot tensor and drops the sum(y) accumulator.
# ---------------------------------------------------------------------------
def _make_label_kernel(HW, tile, n_tiles, two_d):
    def kernel(yp_ref, lbl_ref, tp_out_ref, tp_acc):
        if two_d:
            s, t = pl.program_id(0), pl.program_id(1)
            n_t = pl.num_programs(1)
        else:
            s, t = 0, pl.program_id(0)
            n_t = pl.num_programs(0)

        @pl.when(t == 0)
        def _():
            tp_acc[...] = jnp.zeros_like(tp_acc)

        B, C, _ = yp_ref.shape
        base = (s * n_tiles + t) * tile
        lane = jax.lax.broadcasted_iota(jnp.int32, (B, tile), 1)
        valid = (base + lane) < HW                                 # (B, T)

        logits = jnp.where(valid[:, None, :], yp_ref[...].astype(jnp.float32), 0.0)
        m = jnp.max(logits, axis=1, keepdims=True)
        e = jnp.exp(logits - m)                                    # (B, C, T)
        denom = jnp.sum(e, axis=1)                                 # (B, T)

        labels = lbl_ref[...].astype(jnp.int32)                    # (B, T)
        ch = jax.lax.broadcasted_iota(jnp.int32, (B, C, tile), 1)
        onehot = (ch == labels[:, None, :]).astype(jnp.float32)
        num = jnp.sum(e * onehot, axis=1)                          # (B, T)

        tp_pix = num * pl.reciprocal(denom, approx=True)
        tp_acc[...] += jnp.where(valid, tp_pix, 0.0)

        @pl.when(t == n_t - 1)
        def _():
            tp_out_ref[...] = jnp.broadcast_to(
                jnp.sum(tp_acc[...], axis=-1, keepdims=True), (B, 128))[None]

    return kernel


def tversky_loss_from_labels(y_pred, labels, beta, *, n_splits=None,
                             vmem_budget_bytes=None, vmem_limit_bytes=None,
                             max_tile=131072):
    """Equivalent to tversky_loss(y_pred, one_hot(labels), beta) for hard targets."""
    B, C = int(y_pred.shape[0]), int(y_pred.shape[1])
    HW = 1
    for d in y_pred.shape[2:]:
        HW *= int(d)
    yp = y_pred.reshape(B, C, HW)
    lbl = labels.reshape(B, HW)

    dflt_splits, dflt_budget, dflt_limit = _tpu_defaults()
    n_splits = dflt_splits if n_splits is None else n_splits
    budget = dflt_budget if vmem_budget_bytes is None else vmem_budget_bytes
    vmem_limit = dflt_limit if vmem_limit_bytes is None else vmem_limit_bytes

    bytes_per_lane = (_block_bytes_per_lane(B, C, yp.dtype)
                      + _block_bytes_per_lane(1, B, lbl.dtype)
                      + _round_up(B, 8) * 4)
    tile = _pick_tile(HW, n_splits, bytes_per_lane, budget, max_tile)

    n_blocks = _cdiv(HW, tile)
    n_splits = max(1, min(n_splits, n_blocks))
    n_tiles = _cdiv(n_blocks, n_splits)
    last_block = n_blocks - 1
    two_d = n_splits > 1

    if two_d:
        blk = lambda s, t: jnp.minimum(s * n_tiles + t, last_block)
        grid = (n_splits, n_tiles)
        in_map3 = lambda s, t: (0, 0, blk(s, t))
        in_map2 = lambda s, t: (0, blk(s, t))
        out_map = lambda s, t: (s, 0, 0)
        semantics = ("parallel", "arbitrary")
    else:
        grid = (n_tiles,)
        in_map3 = lambda t: (0, 0, jnp.minimum(t, last_block))
        in_map2 = lambda t: (0, jnp.minimum(t, last_block))
        out_map = lambda t: (0, 0, 0)
        semantics = ("arbitrary",)

    kernel = _make_label_kernel(HW, tile, n_tiles, two_d)
    tp_parts = pl.pallas_call(
        kernel,
        out_shape=jax.ShapeDtypeStruct((n_splits, B, 128), jnp.float32),
        grid=grid,
        in_specs=[pl.BlockSpec((B, C, tile), in_map3),
                  pl.BlockSpec((B, tile), in_map2)],
        out_specs=pl.BlockSpec((1, B, 128), out_map),
        scratch_shapes=[pltpu.VMEM((B, tile), jnp.float32)],
        compiler_params=pltpu.CompilerParams(
            dimension_semantics=semantics, vmem_limit_bytes=vmem_limit),
    )(yp, lbl)

    tp = jnp.sum(tp_parts[:, :, 0], axis=0)
    # Hard one-hot targets: sum(y) == HW per batch, so fn == fp == HW - tp.
    fn = jnp.float32(HW) - tp
    fp = fn
    ti = (tp + 1.0) / (1.0 + tp + beta * fn + (1.0 - beta) * fp)
    return jnp.mean(1.0 - ti)


# ---------------------------------------------------------------------------
def _reference_loss(y_pred, y_true, beta):
    # Pure-JAX reference mirroring the PyTorch module (NCHW, addone=True).
    probs = jax.nn.softmax(y_pred, axis=1)
    B = probs.shape[0]
    p = probs.reshape(B, -1)
    t = y_true.reshape(B, -1)
    tp = jnp.sum(p * t, axis=1)
    fn = jnp.sum((1.0 - p) * t, axis=1)
    fp = jnp.sum(p * (1.0 - t), axis=1)
    ti = (tp + 1.0) / (1.0 + tp + beta * fn + (1.0 - beta) * fp)
    return jnp.mean(1.0 - ti)


if __name__ == "__main__":
    key = jax.random.PRNGKey(0)
    k_pred, k_lbl = jax.random.split(key)

    B, C, H, W = 2, 4, 16, 16
    beta = 0.7

    logits_f32 = jax.random.normal(k_pred, (B, C, H, W), dtype=jnp.float32)
    labels = jax.random.randint(k_lbl, (B, H, W), 0, C, dtype=jnp.int32)
    onehot_f32 = jax.nn.one_hot(labels, C, dtype=jnp.float32).transpose(0, 3, 1, 2)

    # bf16 at the HBM boundary halves input bytes; the kernel computes in f32.
    y_pred = logits_f32.astype(jnp.bfloat16)
    y_true = onehot_f32.astype(jnp.bfloat16)   # 0/1 exactly representable

    loss_dense = jax.block_until_ready(tversky_loss(y_pred, y_true, beta))
    loss_label = jax.block_until_ready(tversky_loss_from_labels(y_pred, labels, beta))

    ref = jax.block_until_ready(_reference_loss(
        y_pred.astype(jnp.float32), y_true.astype(jnp.float32), beta))

    # Tolerance covers pl.reciprocal(approx=True) in the per-pixel softmax divide.
    assert jnp.allclose(loss_dense, ref, rtol=2e-3, atol=2e-3), (loss_dense, ref)
    assert jnp.allclose(loss_label, ref, rtol=2e-3, atol=2e-3), (loss_label, ref)
    print("KERNEL_OK")
</pallas_src>

<mosaic_0001>
module attributes {stable_mosaic.version = 11 : i64} {
  func.func @kernel(%arg0: i32, %arg1: memref<2x4x256xbf16, #tpu.memory_space<vmem>>, %arg2: memref<2x4x256xbf16, #tpu.memory_space<vmem>>, %arg3: memref<1x2x128xf32, #tpu.memory_space<vmem>>, %arg4: memref<1x2x128xf32, #tpu.memory_space<vmem>>, %arg5: memref<2x256xf32, #tpu.memory_space<vmem>>, %arg6: memref<2x256xf32, #tpu.memory_space<vmem>>) attributes {dimension_semantics = [#tpu.dimension_semantics<arbitrary>], iteration_bounds = array<i64: 1>, scalar_prefetch = 0 : i64, scratch_operands = 2 : i64, tpu.core_type = #tpu.core_type<tc>, window_params = [{transform_indices = @transform_0, window_bounds = array<i64: 2, 4, 256>}, {transform_indices = @transform_1, window_bounds = array<i64: 2, 4, 256>}, {pipeline_mode = #tpu.pipeline_mode<synchronous>, transform_indices = @transform_2, window_bounds = array<i64: 1, 2, 128>}, {pipeline_mode = #tpu.pipeline_mode<synchronous>, transform_indices = @transform_3, window_bounds = array<i64: 1, 2, 128>}]} {
    %c0_i32 = arith.constant 0 : i32
    %0 = arith.cmpi eq, %arg0, %c0_i32 : i32
    %1 = arith.extui %0 : i1 to i32
    %c0_i32_0 = arith.constant 0 : i32
    %2 = arith.cmpi ne, %1, %c0_i32_0 : i32
    scf.if %2 {
      %cst_23 = arith.constant 0.000000e+00 : f32
      %42 = vector.broadcast %cst_23 : f32 to vector<2x256xf32>
      %c0_24 = arith.constant 0 : index
      %c0_25 = arith.constant 0 : index
      %43 = vector.load %arg5[%c0_24, %c0_25] : memref<2x256xf32, #tpu.memory_space<vmem>>, vector<2x256xf32>
      tpu.vector_store %arg5[%c0_24, %c0_25], %42 {strides = array<i32>} : memref<2x256xf32, #tpu.memory_space<vmem>>, vector<2x256xf32>,
      %cst_26 = arith.constant 0.000000e+00 : f32
      %44 = vector.broadcast %cst_26 : f32 to vector<2x256xf32>
      %c0_27 = arith.constant 0 : index
      %c0_28 = arith.constant 0 : index
      %45 = vector.load %arg6[%c0_27, %c0_28] : memref<2x256xf32, #tpu.memory_space<vmem>>, vector<2x256xf32>
      tpu.vector_store %arg6[%c0_27, %c0_28], %44 {strides = array<i32>} : memref<2x256xf32, #tpu.memory_space<vmem>>, vector<2x256xf32>,
    } else {
    }
    %c0_i32_1 = arith.constant 0 : i32
    %3 = arith.addi %c0_i32_1, %arg0 : i32
    %c256_i32 = arith.constant 256 : i32
    %4 = arith.muli %3, %c256_i32 : i32
    %5 = tpu.iota {dimensions = array<i32: 2>} : vector<1x1x256xi32>
    %6 = vector.broadcast %4 : i32 to vector<1x1x256xi32>
    %7 = arith.addi %6, %5 : vector<1x1x256xi32>
    %c256_i32_2 = arith.constant 256 : i32
    %8 = vector.broadcast %c256_i32_2 : i32 to vector<1x1x256xi32>
    %9 = arith.cmpi slt, %7, %8 : vector<1x1x256xi32>
    %c0 = arith.constant 0 : index
    %c0_3 = arith.constant 0 : index
    %c0_4 = arith.constant 0 : index
    %10 = vector.load %arg1[%c0, %c0_3, %c0_4] : memref<2x4x256xbf16, #tpu.memory_space<vmem>>, vector<2x4x256xbf16>
    %11 = arith.extf %10 : vector<2x4x256xbf16> to vector<2x4x256xf32>
    %cst = arith.constant 0.000000e+00 : f32
    %12 = vector.shape_cast %9 : vector<1x1x256xi1> to vector<1x1x256xi1>
    %13 = vector.broadcast %12 : vector<1x1x256xi1> to vector<2x4x256xi1>
    %14 = vector.broadcast %cst : f32 to vector<2x4x256xf32>
    %15 = arith.select %13, %11, %14 : vector<2x4x256xi1>, vector<2x4x256xf32>
    %c0_5 = arith.constant 0 : index
    %c0_6 = arith.constant 0 : index
    %c0_7 = arith.constant 0 : index
    %16 = vector.load %arg2[%c0_5, %c0_6, %c0_7] : memref<2x4x256xbf16, #tpu.memory_space<vmem>>, vector<2x4x256xbf16>
    %17 = arith.extf %16 : vector<2x4x256xbf16> to vector<2x4x256xf32>
    %cst_8 = arith.constant 0.000000e+00 : f32
    %18 = vector.shape_cast %9 : vector<1x1x256xi1> to vector<1x1x256xi1>
    %19 = vector.broadcast %18 : vector<1x1x256xi1> to vector<2x4x256xi1>
    %20 = vector.broadcast %cst_8 : f32 to vector<2x4x256xf32>
    %21 = arith.select %19, %17, %20 : vector<2x4x256xi1>, vector<2x4x256xf32>
    %cst_9 = arith.constant dense<0xFF800000> : vector<2x256xf32>
    %22 = vector.multi_reduction <maximumf>, %15, %cst_9 [1] : vector<2x4x256xf32> to vector<2x256xf32>
    %23 = vector.shape_cast %22 : vector<2x256xf32> to vector<2x1x256xf32>
    %24 = vector.broadcast %23 : vector<2x1x256xf32> to vector<2x4x256xf32>
    %25 = arith.subf %15, %24 : vector<2x4x256xf32>
    %26 = math.exp %25 : vector<2x4x256xf32>
    %cst_10 = arith.constant dense<0.000000e+00> : vector<2x256xf32>
    %27 = vector.multi_reduction <add>, %26, %cst_10 [1] : vector<2x4x256xf32> to vector<2x256xf32>
    %28 = arith.mulf %26, %21 : vector<2x4x256xf32>
    %cst_11 = arith.constant dense<0.000000e+00> : vector<2x256xf32>
    %29 = vector.multi_reduction <add>, %28, %cst_11 [1] : vector<2x4x256xf32> to vector<2x256xf32>
    %c0_12 = arith.constant 0 : index
    %c0_13 = arith.constant 0 : index
    %30 = vector.load %arg5[%c0_12, %c0_13] : memref<2x256xf32, #tpu.memory_space<vmem>>, vector<2x256xf32>
    %31 = tpu.reciprocal %27 {approx = true} : vector<2x256xf32> -> vector<2x256xf32>
    %32 = arith.mulf %29, %31 : vector<2x256xf32>
    %33 = arith.addf %30, %32 : vector<2x256xf32>
    %c0_14 = arith.constant 0 : index
    %c0_15 = arith.constant 0 : index
    %34 = vector.load %arg5[%c0_14, %c0_15] : memref<2x256xf32, #tpu.memory_space<vmem>>, vector<2x256xf32>
    tpu.vector_store %arg5[%c0_14, %c0_15], %33 {strides = array<i32>} : memref<2x256xf32, #tpu.memory_space<vmem>>, vector<2x256xf32>,
    %c0_16 = arith.constant 0 : index
    %c0_17 = arith.constant 0 : index
    %35 = vector.load %arg6[%c0_16, %c0_17] : memref<2x256xf32, #tpu.memory_space<vmem>>, vector<2x256xf32>
    %cst_18 = arith.constant dense<0.000000e+00> : vector<2x256xf32>
    %36 = vector.multi_reduction <add>, %21, %cst_18 [1] : vector<2x4x256xf32> to vector<2x256xf32>
    %37 = arith.addf %35, %36 : vector<2x256xf32>
    %c0_19 = arith.constant 0 : index
    %c0_20 = arith.constant 0 : index
    %38 = vector.load %arg6[%c0_19, %c0_20] : memref<2x256xf32, #tpu.memory_space<vmem>>, vector<2x256xf32>
    tpu.vector_store %arg6[%c0_19, %c0_20], %37 {strides = array<i32>} : memref<2x256xf32, #tpu.memory_space<vmem>>, vector<2x256xf32>,
    %c0_i32_21 = arith.constant 0 : i32
    %39 = arith.cmpi eq, %arg0, %c0_i32_21 : i32
    %40 = arith.extui %39 : i1 to i32
    %c0_i32_22 = arith.constant 0 : i32
    %41 = arith.cmpi ne, %40, %c0_i32_22 : i32
    scf.if %41 {
      %c0_23 = arith.constant 0 : index
      %c0_24 = arith.constant 0 : index
      %42 = vector.load %arg5[%c0_23, %c0_24] : memref<2x256xf32, #tpu.memory_space<vmem>>, vector<2x256xf32>
      %cst_25 = arith.constant dense<0.000000e+00> : vector<2xf32>
      %43 = vector.multi_reduction <add>, %42, %cst_25 [1] : vector<2x256xf32> to vector<2xf32>
      %44 = vector.shape_cast %43 : vector<2xf32> to vector<2x1xf32>
      %45 = vector.shape_cast %44 : vector<2x1xf32> to vector<2x1xf32>
      %46 = vector.broadcast %45 : vector<2x1xf32> to vector<2x128xf32>
      %47 = vector.shape_cast %46 : vector<2x128xf32> to vector<1x2x128xf32>
      %c0_26 = arith.constant 0 : index
      %c0_27 = arith.constant 0 : index
      %c0_28 = arith.constant 0 : index
      %48 = vector.load %arg3[%c0_26, %c0_27, %c0_28] : memref<1x2x128xf32, #tpu.memory_space<vmem>>, vector<1x2x128xf32>
      tpu.vector_store %arg3[%c0_26, %c0_27, %c0_28], %47 {strides = array<i32>} : memref<1x2x128xf32, #tpu.memory_space<vmem>>, vector<1x2x128xf32>,
      %c0_29 = arith.constant 0 : index
      %c0_30 = arith.constant 0 : index
      %49 = vector.load %arg6[%c0_29, %c0_30] : memref<2x256xf32, #tpu.memory_space<vmem>>, vector<2x256xf32>
      %cst_31 = arith.constant dense<0.000000e+00> : vector<2xf32>
      %50 = vector.multi_reduction <add>, %49, %cst_31 [1] : vector<2x256xf32> to vector<2xf32>
      %51 = vector.shape_cast %50 : vector<2xf32> to vector<2x1xf32>
      %52 = vector.shape_cast %51 : vector<2x1xf32> to vector<2x1xf32>
      %53 = vector.broadcast %52 : vector<2x1xf32> to vector<2x128xf32>
      %54 = vector.shape_cast %53 : vector<2x128xf32> to vector<1x2x128xf32>
      %c0_32 = arith.constant 0 : index
      %c0_33 = arith.constant 0 : index
      %c0_34 = arith.constant 0 : index
      %55 = vector.load %arg4[%c0_32, %c0_33, %c0_34] : memref<1x2x128xf32, #tpu.memory_space<vmem>>, vector<1x2x128xf32>
      tpu.vector_store %arg4[%c0_32, %c0_33, %c0_34], %54 {strides = array<i32>} : memref<1x2x128xf32, #tpu.memory_space<vmem>>, vector<1x2x128xf32>,
    } else {
    }
    return
  }
  func.func @transform_0(%arg0: i32) -> (i32, i32, i32) {
    %c0_i32 = arith.constant 0 : i32
    %0 = arith.minsi %arg0, %c0_i32 : i32
    %c0_i32_0 = arith.constant 0 : i32
    %c0_i32_1 = arith.constant 0 : i32
    %c0_i32_2 = arith.constant 0 : i32
    return %c0_i32_0, %c0_i32_1, %0 : i32, i32, i32
  }
  func.func @transform_1(%arg0: i32) -> (i32, i32, i32) {
    %c0_i32 = arith.constant 0 : i32
    %0 = arith.minsi %arg0, %c0_i32 : i32
    %c0_i32_0 = arith.constant 0 : i32
    %c0_i32_1 = arith.constant 0 : i32
    %c0_i32_2 = arith.constant 0 : i32
    return %c0_i32_0, %c0_i32_1, %0 : i32, i32, i32
  }
  func.func @transform_2(%arg0: i32) -> (i32, i32, i32) {
    %c0_i32 = arith.constant 0 : i32
    %c0_i32_0 = arith.constant 0 : i32
    %c0_i32_1 = arith.constant 0 : i32
    %c0_i32_2 = arith.constant 0 : i32
    return %c0_i32, %c0_i32_0, %c0_i32_1 : i32, i32, i32
  }
  func.func @transform_3(%arg0: i32) -> (i32, i32, i32) {
    %c0_i32 = arith.constant 0 : i32
    %c0_i32_0 = arith.constant 0 : i32
    %c0_i32_1 = arith.constant 0 : i32
    %c0_i32_2 = arith.constant 0 : i32
    return %c0_i32, %c0_i32_0, %c0_i32_1 : i32, i32, i32
  }
}

</mosaic_0001>

<bundles_post_ra>
// kernel: tpu_custom_call.1
= control target key start
LH: loop header
LB: loop body
LE: loop exit
PB: predicated region body
PF: predicated region fallthrough
CT: control target
= control target key end

     0   :  { %9 = vsyncpa [#allocation5], 0  ;;  %s647_s0 = inlined_call_operand.hbm [shape: bf16[2,4,256], index: 0, kind: input, shape index: {}]   ;;  %s648_s1 = inlined_call_operand.hbm [shape: bf16[2,4,256], index: 1, kind: input, shape index: {}]   ;;  %s649_s2 = inlined_call_operand.hbm [shape: f32[1,2,128], index: 2, kind: output, shape index: {0}]   ;;  %s650_s3 = inlined_call_operand.hbm [shape: f32[1,2,128], index: 3, kind: output, shape index: {1}]  }
   0x1   :  { %10 = vsyncpa [#allocation8], 0 }
   0x2   :  { %11 = vsyncpa [#allocation6], 0 }
   0x3   :  { %12 = vsyncpa [#allocation11], 0  ;;  %s495_s12 = smov [#allocation4]   ;;  %s399_s16 = scalar_lea.hbm %s647_s0, 128 }
   0x4   :  { %s18_s13 = sshll.u32 %s495_s12, 4  ;;  %p400_p0 = scmp.ne.s32.totalorder %s647_s0, %s399_s16  ;;  %s19_s13 = int_to_ptr.vmem [resolvable:$true] %s18_s13 }
   0x5   :  { %p403_p1 = scmp.lt.u32.totalorder %s399_s16, %s647_s0 }
   0x7   :  { %p405_p2 = pnand %p403_p1, %p400_p0 }
   0x9   :  { %408 = shalt.err (!%p405_p2)
}
   0xa   :  { %s409_s21 = scalar_lea.vmem %s19_s13, 128  ;;  %p414_p4 = scmp.lt.s32.totalorder %s19_s13, %s19_s13 }
   0xb   :  { %p410_p3 = scmp.ne.s32.totalorder %s19_s13, %s409_s21  ;;  %p415_p5 = scmp.lt.s32.totalorder %s409_s21, %s409_s21 }
   0xd   :  { %p416_p6 = por %p415_p5, %p414_p4 }
   0xf   :  { %p417_p7 = pnand %p416_p6, %p410_p3 }
  0x11   :  { %420 = shalt.err (!%p417_p7)
}
  0x12   :  { %s496_s22 = smov 64   ;;  %s497_s23 = smov 4  }
  0x13   :  { %24 = dma.hbm_to_vmem [thread:$0]  %s647_s0, 128, %s19_s13, [#allocation5], %s496_s22, %s496_s22, %s497_s23  }
  0x14   :  { %s498_s26 = smov [#allocation7]   ;;  %s421_s30 = scalar_lea.hbm %s648_s1, 128 }
  0x15   :  { %s30_s27 = sshll.u32 %s498_s26, 4  ;;  %p422_p8 = scmp.ne.s32.totalorder %s648_s1, %s421_s30  ;;  %s31_s27 = int_to_ptr.vmem [resolvable:$true] %s30_s27 }
  0x16   :  { %p425_p9 = scmp.lt.u32.totalorder %s421_s30, %s648_s1 }
  0x18   :  { %p427_p10 = pnand %p425_p9, %p422_p8 }
  0x1a   :  { %430 = shalt.err (!%p427_p10)
}
  0x1b   :  { %s431_s8 = scalar_lea.vmem %s31_s27, 128  ;;  %p436_p12 = scmp.lt.s32.totalorder %s31_s27, %s31_s27 }
  0x1c   :  { %p432_p11 = scmp.ne.s32.totalorder %s31_s27, %s431_s8  ;;  %p437_p13 = scmp.lt.s32.totalorder %s431_s8, %s431_s8 }
  0x1e   :  { %p438_p0 = por %p437_p13, %p436_p12 }
  0x20   :  { %p439_p1 = pnand %p438_p0, %p432_p11 }
  0x22   :  { %442 = shalt.err (!%p439_p1)
}
  0x23   :  { %36 = dma.hbm_to_vmem [thread:$0]  %s648_s1, 128, %s31_s27, [#allocation8], %s496_s22, %s496_s22, %s497_s23  }
  0x24   :  { %487 = dma.done.wait [#allocation5], 128  }
  0x25   :  { %488 = vsyncadd [#allocation5], 4294967168 }
  0x26   :  { %489 = dma.done.wait [#allocation8], 128  }
  0x27   :  { %490 = vsyncadd [#allocation8], 4294967168  ;;  %v499_v0 = vmov 0.0   ;;  %v208_v1 = vlaneseq  ;;  %v368_v2 = vld [vmem:[#allocation4] sm:$0xff]   ;;  %v372_v3 = vld [vmem:[#allocation7] sm:$0xff]   ;;  %vm90_vm0 = vcmask 1043456  }
  0x28   :  { %47 = vst [vmem:[#allocation2] sm:$0xf] %v499_v0  ;;  %48 = vst [vmem:[#allocation3] sm:$0xf] %v499_v0  ;;  %v547_v4 = vunpack.c.l.bf16 %v368_v2  ;;  %v549_v5 = vunpack.c.h.bf16 %v368_v2  ;;  %v551_v6 = vunpack.c.l.bf16 %v372_v3  ;;  %v553_v7 = vunpack.c.h.bf16 %v372_v3  ;;  %s501_s1 = smov [#allocation9]   ;;  %s502_s11 = smov [#allocation10]  }
  0x29   :  { %v500_v8 = vmov 1983009808   ;;  %v557_v10 = vshrl.u32 %v208_v1, 7  ;;  %vm225_vm1 = vcmask 1041409   ;;  %vm227_vm2 = vcmask 1043459   ;;  %s341_s10 = sshll.u32 %s501_s1, 4  ;;  %s342_s10 = int_to_ptr.vmem [resolvable:$true] %s341_s10 }
  0x2a   :  { %v555_v9 = vunpack.c.l.s4 %v500_v8  ;;  %v561_v11 = vcombine.high %v547_v4, %v547_v4  ;;  %v565_v12 = vcombine.high %v549_v5, %v549_v5  ;;  %v569_v13 = vcombine.high %v551_v6, %v551_v6  ;;  %s351_s12 = sshll.u32 %s502_s11, 4  ;;  %s443_s13 = scalar_lea.vmem %s342_s10, 32  ;;  %s352_s12 = int_to_ptr.vmem [resolvable:$true] %s351_s12 }
  0x2b   :  { %v573_v14 = vcombine.high %v553_v7, %v553_v7  ;;  %v91_v15 = vsel %vm90_vm0, %v547_v4, -inf  ;;  %v105_v16 = vsel %vm90_vm0, %v549_v5, -inf  ;;  %v237_v17 = vsel %vm90_vm0, %v551_v6, 0.0  ;;  %p444_p2 = scmp.ne.s32.totalorder %s342_s10, %s443_s13  ;;  %p448_p3 = scmp.lt.s32.totalorder %s342_s10, %s342_s10 }
  0x2c   :  { %v251_v18 = vsel %vm90_vm0, %v553_v7, 0.0  ;;  %v92_v19 = vrot.slane %v91_v15, 4  ;;  %v98_v20 = vsel %vm90_vm0, %v561_v11, -inf  ;;  %v106_v21 = vrot.slane %v105_v16, 4  ;;  %p449_p4 = scmp.lt.s32.totalorder %s443_s13, %s443_s13 }
  0x2d   :  { %v112_v22 = vsel %vm90_vm0, %v565_v12, -inf  ;;  %v99_v23 = vrot.slane %v98_v20, 4  ;;  %v238_v25 = vrot.slane %v237_v17, 4  ;;  %v244_v26 = vsel %vm90_vm0, %v569_v13, 0.0 }
  0x2e   :  { %v113_v24 = vrot.slane %v112_v22, 4  ;;  %v93_v27 = vmax.f32 %v91_v15, %v92_v19  ;;  %v107_v28 = vmax.f32 %v105_v16, %v106_v21  ;;  %v245_v29 = vrot.slane %v244_v26, 4  ;;  %p450_p5 = por %p449_p4, %p448_p3 }
  0x2f   :  { %v252_v30 = vrot.slane %v251_v18, 4  ;;  %v100_v31 = vmax.f32 %v98_v20, %v99_v23  ;;  %v239_v33 = vadd.f32 %v238_v25, %v237_v17  ;;  %v258_v34 = vsel %vm90_vm0, %v573_v14, 0.0 }
  0x30   :  { %v114_v32 = vmax.f32 %v112_v22, %v113_v24  ;;  %v94_v35 = vrot.slane %v93_v27, 2  ;;  %v108_v36 = vrot.slane %v107_v28, 2  ;;  %v246_v37 = vadd.f32 %v245_v29, %v244_v26  ;;  %p451_p6 = pnand %p450_p5, %p444_p2 }
  0x31   :  { %v253_v38 = vadd.f32 %v252_v30, %v251_v18  ;;  %v101_v39 = vrot.slane %v100_v31, 2  ;;  %v240_v41 = vrot.slane %v239_v33, 2  ;;  %v259_v42 = vrot.slane %v258_v34, 4 }
  0x32   :  { %v115_v40 = vrot.slane %v114_v32, 2  ;;  %v95_v43 = vmax.f32 %v93_v27, %v94_v35  ;;  %v109_v44 = vmax.f32 %v107_v28, %v108_v36  ;;  %v247_v45 = vrot.slane %v246_v37, 2  ;;  %v236_v28 = vld [vmem:[#allocation3] sm:$0xf] }
  0x33   :  { %v254_v46 = vrot.slane %v253_v38, 2  ;;  %v102_v47 = vmax.f32 %v100_v31, %v101_v39  ;;  %v241_v49 = vadd.f32 %v240_v41, %v239_v33  ;;  %v260_v50 = vadd.f32 %v259_v42, %v258_v34 }
  0x34   :  { %v116_v48 = vmax.f32 %v114_v32, %v115_v40  ;;  %v96_v51 = vrot.slane %v95_v43, 1  ;;  %v110_v52 = vrot.slane %v109_v44, 1  ;;  %v248_v53 = vadd.f32 %v247_v45, %v246_v37 }
  0x35   :  { %v255_v54 = vadd.f32 %v254_v46, %v253_v38  ;;  %v103_v55 = vrot.slane %v102_v47, 1  ;;  %v242_v57 = vrot.slane %v241_v49, 1  ;;  %v261_v58 = vrot.slane %v260_v50, 2 }
  0x36   :  { %v117_v56 = vrot.slane %v116_v48, 1  ;;  %v97_v59 = vmax.f32 %v95_v43, %v96_v51  ;;  %v111_v60 = vmax.f32 %v109_v44, %v110_v52  ;;  %v249_v61 = vrot.slane %v248_v53, 1 }
  0x37   :  { %v256_v62 = vrot.slane %v255_v54, 1  ;;  %v104_v63 = vmax.f32 %v102_v47, %v103_v55  ;;  %v243_v1 = vadd.f32 %v242_v57, %v241_v49  ;;  %v262_v2 = vadd.f32 %v261_v58, %v260_v50 }
  0x38   :  { %v118_v0 = vmax.f32 %v116_v48, %v117_v56  ;;  %v119_v3 = vsub.f32 %v547_v4, %v97_v59  ;;  %v121_v8 = vsub.f32 %v549_v5, %v111_v60  ;;  %v207_v15 = vunpack.c.0.s8 %v555_v9 }
  0x39   :  { %v250_v16 = vadd.f32 %v249_v61, %v248_v53  ;;  %v120_v17 = vsub.f32 %v561_v11, %v104_v63  ;;  %v257_v19 = vadd.f32 %v256_v62, %v255_v54  ;;  %v263_v20 = vrot.slane %v262_v2, 1 }
  0x3a   :  { %v122_v18 = vsub.f32 %v565_v12, %v118_v0  ;;  %v123_v21 = vmul.f32 1.442695, %v119_v3  ;;  %v127_v22 = vmul.f32 1.442695, %v121_v8  ;;  %v597_v4 = vsub.s32 %v207_v15, %v557_v10 }
  0x3b   :  { %v125_v23 = vmul.f32 1.442695, %v120_v17  ;;  %v264_v25 = vadd.f32 %v263_v20, %v262_v2  ;;  %v269_v26 = vcombine.low %v243_v1, %v250_v16  ;;  %vm229_vm3 = vcmask 1045509  }
  0x3c   :  { %v129_v24 = vmul.f32 1.442695, %v122_v18  ;;  %383 = vpow2.f32 %v123_v21  ;;  %vm231_vm4 = vcmask 1047559   ;;  %vm310_vm5 = vcmask 1041408  }
  0x3d   :  { %385 = vpow2.f32 %v125_v23  ;;  %v277_v5 = vcombine.low %v257_v19, %v264_v25  ;;  %v276_v9 = vrot.slane %v269_v26, %v597_v4 }
  0x3e   :  { %387 = vpow2.f32 %v127_v22 }
  0x3f   :  { %389 = vpow2.f32 %v129_v24  ;;  %v284_v11 = vrot.slane %v277_v5, %v597_v4 }
  0x41   :  { %v287_v12 = vrot.slane %v284_v11, 7 }
  0x43   :  { %v288_v27 = vsel %vm225_vm1, %v287_v12, %v276_v9 }
  0x44   :  { %v289_v29 = vsel %vm227_vm2, %v287_v12, %v288_v27 }
  0x45   :  { %v290_v10 = vsel %vm229_vm3, %v287_v12, %v289_v29 }
  0x46   :  { %v384_v30 = vpop.eup %383  ;;  %v291_v31 = vsel %vm231_vm4, %v287_v12, %v290_v10 }
  0x47   :  { %v386_v32 = vpop.eup %385  ;;  %v131_v33 = vsel %vm90_vm0, %v384_v30, 0.0  ;;  %v159_v34 = vmul.f32 %v384_v30, %v551_v6  ;;  %v293_v35 = vadd.f32 %v291_v31, %v236_v28 }
  0x48   :  { %v388_v36 = vpop.eup %387  ;;  %v132_v37 = vrot.slane %v131_v33, 4  ;;  %v138_v38 = vsel %vm90_vm0, %v386_v32, 0.0  ;;  %v160_v39 = vmul.f32 %v386_v32, %v569_v13 }
  0x49   :  { %v390_v40 = vpop.eup %389  ;;  %v139_v41 = vrot.slane %v138_v38, 4  ;;  %v145_v42 = vsel %vm90_vm0, %v388_v36, 0.0  ;;  %v161_v43 = vmul.f32 %v388_v36, %v553_v7  ;;  %v163_v44 = vsel %vm90_vm0, %v159_v34, 0.0  ;;  %294 = vst [vmem:[#allocation3] sm:$0xf] %v293_v35 }
  0x4a   :  { %v133_v45 = vadd.f32 %v132_v37, %v131_v33  ;;  %v146_v46 = vrot.slane %v145_v42, 4  ;;  %v152_v6 = vsel %vm90_vm0, %v390_v40, 0.0  ;;  %v162_v47 = vmul.f32 %v390_v40, %v573_v14 }
  0x4b   :  { %v140_v48 = vadd.f32 %v139_v41, %v138_v38  ;;  %v153_v49 = vrot.slane %v152_v6, 4  ;;  %v164_v50 = vrot.slane %v163_v44, 4  ;;  %v170_v13 = vsel %vm90_vm0, %v160_v39, 0.0 }
  0x4c   :  { %v134_v51 = vrot.slane %v133_v45, 2  ;;  %v147_v52 = vadd.f32 %v146_v46, %v145_v42  ;;  %v171_v53 = vrot.slane %v170_v13, 4  ;;  %v177_v54 = vsel %vm90_vm0, %v161_v43, 0.0 }
  0x4d   :  { %v141_v7 = vrot.slane %v140_v48, 2  ;;  %v154_v55 = vadd.f32 %v153_v49, %v152_v6  ;;  %v165_v56 = vadd.f32 %v164_v50, %v163_v44  ;;  %v178_v57 = vrot.slane %v177_v54, 4  ;;  %v191_v6 = vld [vmem:[#allocation2] sm:$0xf] }
  0x4e   :  { %v135_v58 = vadd.f32 %v134_v51, %v133_v45  ;;  %v148_v59 = vrot.slane %v147_v52, 2  ;;  %v172_v60 = vadd.f32 %v171_v53, %v170_v13  ;;  %v184_v61 = vsel %vm90_vm0, %v162_v47, 0.0 }
  0x4f   :  { %v142_v14 = vadd.f32 %v141_v7, %v140_v48  ;;  %v155_v62 = vrot.slane %v154_v55, 2  ;;  %v166_v63 = vrot.slane %v165_v56, 2  ;;  %v179_v0 = vadd.f32 %v178_v57, %v177_v54 }
  0x50   :  { %v136_v1 = vrot.slane %v135_v58, 1  ;;  %v149_v2 = vadd.f32 %v148_v59, %v147_v52  ;;  %v173_v3 = vrot.slane %v172_v60, 2  ;;  %v185_v8 = vrot.slane %v184_v61, 4 }
  0x51   :  { %v143_v15 = vrot.slane %v142_v14, 1  ;;  %v156_v16 = vadd.f32 %v155_v62, %v154_v55  ;;  %v180_v17 = vrot.slane %v179_v0, 2  ;;  %v167_v23 = vadd.f32 %v166_v63, %v165_v56  ;;  %v366_v13 = vld.sshfl [vmem:[#allocation3] sm:$0x33 pattern:$0x76325410] }
  0x52   :  { %v137_v18 = vadd.f32 %v136_v1, %v135_v58  ;;  %v150_v19 = vrot.slane %v149_v2, 1  ;;  %v186_v20 = vadd.f32 %v185_v8, %v184_v61  ;;  %v174_v25 = vadd.f32 %v173_v3, %v172_v60 }
  0x53   :  { %v144_v21 = vadd.f32 %v143_v15, %v142_v14  ;;  %v157_v22 = vrot.slane %v156_v16, 1  ;;  %v181_v9 = vadd.f32 %v180_v17, %v179_v0  ;;  %v168_v12 = vrot.slane %v167_v23, 1 }
  0x54   :  { %v151_v24 = vadd.f32 %v150_v19, %v149_v2  ;;  %v187_v26 = vrot.slane %v186_v20, 2  ;;  %391 = vrcp.f32 %v137_v18  ;;  %v175_v27 = vrot.slane %v174_v25, 1 }
  0x55   :  { %v158_v5 = vadd.f32 %v157_v22, %v156_v16  ;;  %393 = vrcp.f32 %v144_v21  ;;  %v182_v28 = vrot.slane %v181_v9, 1  ;;  %v169_v10 = vadd.f32 %v168_v12, %v167_v23 }
  0x56   :  { %v188_v11 = vadd.f32 %v187_v26, %v186_v20  ;;  %395 = vrcp.f32 %v151_v24  ;;  %v176_v30 = vadd.f32 %v175_v27, %v174_v25  ;;  %v326_v51 = vcombine.high %v366_v13, %v366_v13 }
  0x57   :  { %397 = vrcp.f32 %v158_v5  ;;  %v183_v31 = vadd.f32 %v182_v28, %v181_v9 }
  0x58   :  { %v189_v29 = vrot.slane %v188_v11, 1  ;;  %v330_v55 = vsel %vm310_vm5, %v326_v51, 0.0 }
  0x5a   :  { %v190_v33 = vadd.f32 %v189_v29, %v188_v11 }
  0x5e   :  { %v392_v32 = vpop.eup %391 }
  0x5f   :  { %v394_v34 = vpop.eup %393  ;;  %v196_v35 = vmul.f32 %v392_v32, %v169_v10 }
  0x60   :  { %v396_v36 = vpop.eup %395  ;;  %v197_v37 = vmul.f32 %v394_v34, %v176_v30 }
  0x61   :  { %v398_v38 = vpop.eup %397  ;;  %v198_v39 = vmul.f32 %v396_v36, %v183_v31 }
  0x62   :  { %v199_v40 = vmul.f32 %v398_v38, %v190_v33  ;;  %v204_v41 = vcombine.low %v196_v35, %v197_v37 }
  0x64   :  { %v212_v42 = vcombine.low %v198_v39, %v199_v40  ;;  %v211_v43 = vrot.slane %v204_v41, %v597_v4 }
  0x66   :  { %v219_v44 = vrot.slane %v212_v42, %v597_v4  ;;  %v329_v4 = vsel %vm310_vm5, %v366_v13, 0.0 }
  0x67   :  { %v331_v57 = vadd.f32 %v330_v55, %v329_v4 }
  0x68   :  { %v224_v45 = vrot.slane %v219_v44, 7 }
  0x6a   :  { %v226_v46 = vsel %vm225_vm1, %v224_v45, %v211_v43 }
  0x6b   :  { %v228_v47 = vsel %vm227_vm2, %v224_v45, %v226_v46 }
  0x6c   :  { %v230_v48 = vsel %vm229_vm3, %v224_v45, %v228_v47 }
  0x6d   :  { %v232_v49 = vsel %vm231_vm4, %v224_v45, %v230_v48 }
  0x6e   :  { %v234_v50 = vadd.f32 %v232_v49, %v191_v6 }
  0x70   :  { %235 = vst [vmem:[#allocation2] sm:$0xf] %v234_v50 }
  0x77   :  { %v365_v52 = vld.sshfl [vmem:[#allocation2] sm:$0x33 pattern:$0x76325410] }
  0x78   :  { %v307_v53 = vcombine.high %v365_v52, %v365_v52  ;;  %v311_v54 = vsel %vm310_vm5, %v365_v52, 0.0 }
  0x7a   :  { %v312_v7 = vsel %vm310_vm5, %v307_v53, 0.0 }
  0x7b   :  { %v313_v56 = vadd.f32 %v312_v7, %v311_v54 }
  0x7d   :  { %314 = vadd.xlane.f32.xlu0 %v313_v56 }
  0x81   :  { %332 = vadd.xlane.f32.xlu0 %v331_v57 }
 0x10a   :  { %v315_v58 = vpop.xlane.xlu0 %314 }
 0x10b   :  { %316 = vst [vmem:[#allocation9] sm:$0x3] %v315_v58 }
 0x10c   :  { %454 = shalt.err (!%p451_p6)
}
 0x10d   :  { %s455_s16 = scalar_lea.hbm %s649_s2, 32 }
 0x10e   :  { %p456_p7 = scmp.ne.s32.totalorder %s649_s2, %s455_s16  ;;  %p459_p8 = scmp.lt.u32.totalorder %s455_s16, %s649_s2 }
 0x110   :  { %p461_p9 = pnand %p459_p8, %p456_p7 }
 0x112   :  { %464 = shalt.err (!%p461_p9)
}
 0x113   :  { %344 = dma.vmem_to_hbm [thread:$0]  %s342_s10, 32, %s649_s2, [#allocation6]   ;;  %v333_v59 = vpop.xlane.xlu0 %332 }
 0x114   :  { %334 = vst [vmem:[#allocation10] sm:$0x3] %v333_v59  ;;  %s465_s23 = scalar_lea.vmem %s352_s12, 32  ;;  %p470_p11 = scmp.lt.s32.totalorder %s352_s12, %s352_s12 }
 0x115   :  { %p466_p10 = scmp.ne.s32.totalorder %s352_s12, %s465_s23  ;;  %p471_p12 = scmp.lt.s32.totalorder %s465_s23, %s465_s23 }
 0x117   :  { %p472_p13 = por %p471_p12, %p470_p11 }
 0x119   :  { %p473_p0 = pnand %p472_p13, %p466_p10 }
 0x11b   :  { %476 = shalt.err (!%p473_p0)
}
 0x11c   :  { %s477_s26 = scalar_lea.hbm %s650_s3, 32 }
 0x11d   :  { %p478_p1 = scmp.ne.s32.totalorder %s650_s3, %s477_s26  ;;  %p481_p2 = scmp.lt.u32.totalorder %s477_s26, %s650_s3 }
 0x11f   :  { %p483_p3 = pnand %p481_p2, %p478_p1 }
 0x121   :  { %486 = shalt.err (!%p483_p3)
}
 0x122   :  { %354 = dma.vmem_to_hbm [thread:$0]  %s352_s12, 32, %s650_s3, [#allocation11]  }
 0x123   :  { %491 = dma.done.wait [#allocation6], 32  }
 0x124   :  { %492 = vsyncadd [#allocation6], 4294967264 }
 0x125   :  { %493 = dma.done.wait [#allocation11], 32  }
 0x126   :  { %494 = vsyncadd [#allocation11], 4294967264 }
 0x127   :  { %361 = vsyncpa [#allocation5], 1 }
 0x128   :  { %362 = vsyncpa [#allocation8], 1 }
 0x129   :  { %363 = vsyncpa [#allocation6], 1 }
 0x12a   :  { %364 = vsyncpa [#allocation11], 1 }

</bundles_post_ra>
